<compile_context>
chip_gen: v7x
topology: tpu7x:2x2x1
jax: 0.10.0
libtpu: 0.0.40
codegen_flags: <defaults>
</compile_context>

<pallas_src>
import functools

import jax
import jax.numpy as jnp
from jax.experimental import pallas as pl
from jax.experimental.pallas import tpu as pltpu

N_INPUT = 2
N_HID1 = 40
N_HID2 = 60
N_OUTPUT = 2 + 2 + 2  # 6

PAD = 128  # lane width; hidden dims (40, 60) are zero-padded to this for the MXU


def _mlp_kernel(x_ref, w1_ref, b1_ref, w2_ref, b2_ref, w3_ref, b3_ref, o_ref):
    x = x_ref[...]          # (tile_b, 2)   -- unpadded input tile
    w1 = w1_ref[...]        # (2, PAD)

    # Layer 1 on the VPU: with K=2, two broadcast mul-adds beat an MXU matmul
    # whose contraction dim would be mostly zeros.
    h1 = x[:, 0:1] * w1[0:1, :] + x[:, 1:2] * w1[1:2, :] + b1_ref[...]
    h1 = jnp.maximum(h1, 0.0)                                   # (tile_b, PAD)

    # Layer 2: MXU matmul + bias + ReLU (padded lanes stay exactly 0).
    h2 = jnp.dot(h1, w2_ref[...], preferred_element_type=jnp.float32) + b2_ref[...]
    h2 = jnp.maximum(h2, 0.0)                                   # (tile_b, PAD)

    # Layer 3: MXU matmul + bias; only the 6 valid output lanes are written.
    out = jnp.dot(h2, w3_ref[...], preferred_element_type=jnp.float32) + b3_ref[...]
    o_ref[...] = out[:, :N_OUTPUT].astype(o_ref.dtype)          # (tile_b, 6)


def _round_up(n, m):
    return ((n + m - 1) // m) * m


def _pad2d(w, rows, cols):
    out = jnp.zeros((rows, cols), dtype=jnp.float32)
    return out.at[: w.shape[0], : w.shape[1]].set(w)


def _pad1d(b, cols):
    out = jnp.zeros((1, cols), dtype=jnp.float32)
    return out.at[0, : b.shape[0]].set(b)


@functools.partial(jax.jit, static_argnames=("tile_b",))
def mlp_forward(x, params, tile_b=1024):
    """x: (B, N_INPUT) float32. Returns (B, N_OUTPUT) float32."""
    w1, b1, w2, b2, w3, b3 = params
    B = x.shape[0]

    # Effective batch tile: a multiple of 8 (sublane tiling), at most `tile_b`,
    # and no larger than the (rounded-up) batch.
    tb = min(tile_b, _round_up(B, 8))
    B_pad = _round_up(B, tb)
    if B_pad != B:
        # Cheap: 8 bytes per padded row (vs. padding features to 128 lanes).
        x = jnp.pad(x, ((0, B_pad - B), (0, 0)))

    # Zero-pad only the tiny weights/biases to lane width (exact math).
    w1_p = _pad2d(w1, N_INPUT, PAD)   # (2, 128)
    w2_p = _pad2d(w2, PAD, PAD)       # (128, 128)
    w3_p = _pad2d(w3, PAD, PAD)       # (128, 128)
    b1_p = _pad1d(b1, PAD)
    b2_p = _pad1d(b2, PAD)
    b3_p = _pad1d(b3, PAD)

    grid = (B_pad // tb,)
    resident = lambda i: (0, 0)  # weights/biases: one block, resident across the grid

    out = pl.pallas_call(
        _mlp_kernel,
        out_shape=jax.ShapeDtypeStruct((B_pad, N_OUTPUT), jnp.float32),
        grid_spec=pltpu.PrefetchScalarGridSpec(
            num_scalar_prefetch=0,
            grid=grid,
            in_specs=[
                pl.BlockSpec((tb, N_INPUT), lambda i: (i, 0)),   # x tile (B, 2), unpadded
                pl.BlockSpec((N_INPUT, PAD), resident),          # W1 (2, 128)
                pl.BlockSpec((1, PAD), resident),                # b1
                pl.BlockSpec((PAD, PAD), resident),              # W2
                pl.BlockSpec((1, PAD), resident),                # b2
                pl.BlockSpec((PAD, PAD), resident),              # W3
                pl.BlockSpec((1, PAD), resident),                # b3
            ],
            out_specs=pl.BlockSpec((tb, N_OUTPUT), lambda i: (i, 0)),  # (B, 6), unpadded
        ),
        compiler_params=pltpu.CompilerParams(
            dimension_semantics=("parallel",),  # batch grid shards across TCs (v7x megacore)
        ),
    )(x, w1_p, b1_p, w2_p, b2_p, w3_p, b3_p)

    if B_pad != B:
        out = out[:B]
    return out


def init_params(key):
    """Deterministic init mimicking PyTorch's Linear default (uniform +/- 1/sqrt(fan_in)).
    Weights are stored as (in_features, out_features) so the kernel does x @ W."""
    def linear(key, fan_in, fan_out):
        kw, kb = jax.random.split(key)
        bound = 1.0 / jnp.sqrt(float(fan_in))
        w = jax.random.uniform(kw, (fan_in, fan_out), jnp.float32, -bound, bound)
        b = jax.random.uniform(kb, (fan_out,), jnp.float32, -bound, bound)
        return w, b

    k1, k2, k3 = jax.random.split(key, 3)
    w1, b1 = linear(k1, N_INPUT, N_HID1)
    w2, b2 = linear(k2, N_HID1, N_HID2)
    w3, b3 = linear(k3, N_HID2, N_OUTPUT)
    return (w1, b1, w2, b2, w3, b3)


def _reference(x, params):
    w1, b1, w2, b2, w3, b3 = params
    h1 = jnp.maximum(x @ w1 + b1, 0.0)
    h2 = jnp.maximum(h1 @ w2 + b2, 0.0)
    return h2 @ w3 + b3


if __name__ == "__main__":
    key = jax.random.PRNGKey(0)
    kx, kp = jax.random.split(key)

    B = 12  # small, deliberately not a multiple of 8 to exercise the ragged-batch path
    x = jax.random.normal(kx, (B, N_INPUT), dtype=jnp.float32)
    params = init_params(kp)

    out = mlp_forward(x, params)
    out = jax.block_until_ready(out)

    ref = _reference(x, params)
    assert out.shape == (B, N_OUTPUT)
    assert jnp.allclose(out, ref, atol=1e-5, rtol=1e-5), "mismatch vs reference"

    print("KERNEL_OK")
</pallas_src>

<mosaic_0001>
module attributes {stable_mosaic.version = 11 : i64} {
  func.func @_mlp_kernel(%arg0: i32, %arg1: memref<16x2xf32, #tpu.memory_space<vmem>>, %arg2: memref<2x128xf32, #tpu.memory_space<vmem>>, %arg3: memref<1x128xf32, #tpu.memory_space<vmem>>, %arg4: memref<128x128xf32, #tpu.memory_space<vmem>>, %arg5: memref<1x128xf32, #tpu.memory_space<vmem>>, %arg6: memref<128x128xf32, #tpu.memory_space<vmem>>, %arg7: memref<1x128xf32, #tpu.memory_space<vmem>>, %arg8: memref<16x6xf32, #tpu.memory_space<vmem>>) attributes {dimension_semantics = [#tpu.dimension_semantics<parallel>], iteration_bounds = array<i64: 1>, scalar_prefetch = 0 : i64, scratch_operands = 0 : i64, tpu.core_type = #tpu.core_type<tc>, window_params = [{transform_indices = @transform_0, window_bounds = array<i64: 16, 2>}, {pipeline_mode = #tpu.pipeline_mode<synchronous>, transform_indices = @transform_1, window_bounds = array<i64: 2, 128>}, {pipeline_mode = #tpu.pipeline_mode<synchronous>, transform_indices = @transform_2, window_bounds = array<i64: 1, 128>}, {pipeline_mode = #tpu.pipeline_mode<synchronous>, transform_indices = @transform_3, window_bounds = array<i64: 128, 128>}, {pipeline_mode = #tpu.pipeline_mode<synchronous>, transform_indices = @transform_4, window_bounds = array<i64: 1, 128>}, {pipeline_mode = #tpu.pipeline_mode<synchronous>, transform_indices = @transform_5, window_bounds = array<i64: 128, 128>}, {pipeline_mode = #tpu.pipeline_mode<synchronous>, transform_indices = @transform_6, window_bounds = array<i64: 1, 128>}, {transform_indices = @transform_7, window_bounds = array<i64: 16, 6>}]} {
    %c0 = arith.constant 0 : index
    %c0_0 = arith.constant 0 : index
    %0 = vector.load %arg1[%c0, %c0_0] : memref<16x2xf32, #tpu.memory_space<vmem>>, vector<16x2xf32>
    %c0_1 = arith.constant 0 : index
    %c0_2 = arith.constant 0 : index
    %1 = vector.load %arg2[%c0_1, %c0_2] : memref<2x128xf32, #tpu.memory_space<vmem>>, vector<2x128xf32>
    %2 = vector.extract_strided_slice %0 {offsets = [0, 0], sizes = [16, 1], strides = [1, 1]} : vector<16x2xf32> to vector<16x1xf32>
    %3 = vector.extract_strided_slice %1 {offsets = [0, 0], sizes = [1, 128], strides = [1, 1]} : vector<2x128xf32> to vector<1x128xf32>
    %4 = vector.broadcast %2 : vector<16x1xf32> to vector<16x128xf32>
    %5 = vector.broadcast %3 : vector<1x128xf32> to vector<16x128xf32>
    %6 = arith.mulf %4, %5 : vector<16x128xf32>
    %7 = vector.extract_strided_slice %0 {offsets = [0, 1], sizes = [16, 1], strides = [1, 1]} : vector<16x2xf32> to vector<16x1xf32>
    %8 = vector.extract_strided_slice %1 {offsets = [1, 0], sizes = [1, 128], strides = [1, 1]} : vector<2x128xf32> to vector<1x128xf32>
    %9 = vector.broadcast %7 : vector<16x1xf32> to vector<16x128xf32>
    %10 = vector.broadcast %8 : vector<1x128xf32> to vector<16x128xf32>
    %11 = arith.mulf %9, %10 : vector<16x128xf32>
    %12 = arith.addf %6, %11 : vector<16x128xf32>
    %c0_3 = arith.constant 0 : index
    %c0_4 = arith.constant 0 : index
    %13 = vector.load %arg3[%c0_3, %c0_4] : memref<1x128xf32, #tpu.memory_space<vmem>>, vector<1x128xf32>
    %14 = vector.broadcast %13 : vector<1x128xf32> to vector<16x128xf32>
    %15 = arith.addf %12, %14 : vector<16x128xf32>
    %cst = arith.constant 0.000000e+00 : f32
    %16 = vector.broadcast %cst : f32 to vector<16x128xf32>
    %17 = arith.maximumf %15, %16 : vector<16x128xf32>
    %c0_5 = arith.constant 0 : index
    %c0_6 = arith.constant 0 : index
    %18 = vector.load %arg4[%c0_5, %c0_6] : memref<128x128xf32, #tpu.memory_space<vmem>>, vector<128x128xf32>
    %cst_7 = arith.constant dense<0.000000e+00> : vector<16x128xf32>
    %19 = tpu.matmul %17, %18, %cst_7 {dimension_numbers = #tpu.dot_dimension_numbers<[1], [0], [0], [1], [0, 0, 1, 1], [], []>} : vector<16x128xf32>, vector<128x128xf32>, vector<16x128xf32> -> vector<16x128xf32>
    %c0_8 = arith.constant 0 : index
    %c0_9 = arith.constant 0 : index
    %20 = vector.load %arg5[%c0_8, %c0_9] : memref<1x128xf32, #tpu.memory_space<vmem>>, vector<1x128xf32>
    %21 = vector.broadcast %20 : vector<1x128xf32> to vector<16x128xf32>
    %22 = arith.addf %19, %21 : vector<16x128xf32>
    %cst_10 = arith.constant 0.000000e+00 : f32
    %23 = vector.broadcast %cst_10 : f32 to vector<16x128xf32>
    %24 = arith.maximumf %22, %23 : vector<16x128xf32>
    %c0_11 = arith.constant 0 : index
    %c0_12 = arith.constant 0 : index
    %25 = vector.load %arg6[%c0_11, %c0_12] : memref<128x128xf32, #tpu.memory_space<vmem>>, vector<128x128xf32>
    %cst_13 = arith.constant dense<0.000000e+00> : vector<16x128xf32>
    %26 = tpu.matmul %24, %25, %cst_13 {dimension_numbers = #tpu.dot_dimension_numbers<[1], [0], [0], [1], [0, 0, 1, 1], [], []>} : vector<16x128xf32>, vector<128x128xf32>, vector<16x128xf32> -> vector<16x128xf32>
    %c0_14 = arith.constant 0 : index
    %c0_15 = arith.constant 0 : index
    %27 = vector.load %arg7[%c0_14, %c0_15] : memref<1x128xf32, #tpu.memory_space<vmem>>, vector<1x128xf32>
    %28 = vector.broadcast %27 : vector<1x128xf32> to vector<16x128xf32>
    %29 = arith.addf %26, %28 : vector<16x128xf32>
    %30 = vector.extract_strided_slice %29 {offsets = [0, 0], sizes = [16, 6], strides = [1, 1]} : vector<16x128xf32> to vector<16x6xf32>
    %c0_16 = arith.constant 0 : index
    %c0_17 = arith.constant 0 : index
    %31 = vector.load %arg8[%c0_16, %c0_17] : memref<16x6xf32, #tpu.memory_space<vmem>>, vector<16x6xf32>
    tpu.vector_store %arg8[%c0_16, %c0_17], %30 {strides = array<i32>} : memref<16x6xf32, #tpu.memory_space<vmem>>, vector<16x6xf32>,
    return
  }
  func.func @transform_0(%arg0: i32) -> (i32, i32) {
    %c0_i32 = arith.constant 0 : i32
    %c0_i32_0 = arith.constant 0 : i32
    return %arg0, %c0_i32 : i32, i32
  }
  func.func @transform_1(%arg0: i32) -> (i32, i32) {
    %c0_i32 = arith.constant 0 : i32
    %c0_i32_0 = arith.constant 0 : i32
    %c0_i32_1 = arith.constant 0 : i32
    return %c0_i32, %c0_i32_0 : i32, i32
  }
  func.func @transform_2(%arg0: i32) -> (i32, i32) {
    %c0_i32 = arith.constant 0 : i32
    %c0_i32_0 = arith.constant 0 : i32
    %c0_i32_1 = arith.constant 0 : i32
    return %c0_i32, %c0_i32_0 : i32, i32
  }
  func.func @transform_3(%arg0: i32) -> (i32, i32) {
    %c0_i32 = arith.constant 0 : i32
    %c0_i32_0 = arith.constant 0 : i32
    %c0_i32_1 = arith.constant 0 : i32
    return %c0_i32, %c0_i32_0 : i32, i32
  }
  func.func @transform_4(%arg0: i32) -> (i32, i32) {
    %c0_i32 = arith.constant 0 : i32
    %c0_i32_0 = arith.constant 0 : i32
    %c0_i32_1 = arith.constant 0 : i32
    return %c0_i32, %c0_i32_0 : i32, i32
  }
  func.func @transform_5(%arg0: i32) -> (i32, i32) {
    %c0_i32 = arith.constant 0 : i32
    %c0_i32_0 = arith.constant 0 : i32
    %c0_i32_1 = arith.constant 0 : i32
    return %c0_i32, %c0_i32_0 : i32, i32
  }
  func.func @transform_6(%arg0: i32) -> (i32, i32) {
    %c0_i32 = arith.constant 0 : i32
    %c0_i32_0 = arith.constant 0 : i32
    %c0_i32_1 = arith.constant 0 : i32
    return %c0_i32, %c0_i32_0 : i32, i32
  }
  func.func @transform_7(%arg0: i32) -> (i32, i32) {
    %c0_i32 = arith.constant 0 : i32
    %c0_i32_0 = arith.constant 0 : i32
    return %arg0, %c0_i32 : i32, i32
  }
}

</mosaic_0001>

<bundles_post_ra>
// kernel: mlp_forward.1
= control target key start
LH: loop header
LB: loop body
LE: loop exit
PB: predicated region body
PF: predicated region fallthrough
CT: control target
= control target key end

     0   :  { %v456_v0 = vmov 0   ;;  %v457_v9 = vmov 1   ;;  %v39_v49 = vlaneseq  ;;  %vm270_vm0 = vcmask 48128   ;;  %s618_s0 = inlined_call_operand.vmem [shape: f32[16,2], index: 0, kind: input, shape index: {}]   ;;  %s619_s3 = inlined_call_operand.vmem [shape: f32[128,128], index: 3, kind: input, shape index: {}]   ;;  %s620_s5 = inlined_call_operand.vmem [shape: f32[128,128], index: 5, kind: input, shape index: {}]   ;;  %s621_s1 = inlined_call_operand.vmem [shape: f32[2,128], index: 1, kind: input, shape index: {}]   ;;  %s622_s2 = inlined_call_operand.vmem [shape: f32[1,128], index: 2, kind: input, shape index: {}]   ;;  %s623_s4 = inlined_call_operand.vmem [shape: f32[1,128], index: 4, kind: input, shape index: {}]   ;;  %s624_s6 = inlined_call_operand.vmem [shape: f32[1,128], index: 6, kind: input, shape index: {}]   ;;  %s625_s7 = inlined_call_operand.vmem [shape: f32[16,6], index: 7, kind: output, shape index: {}]  }
   0x1   :  { %454 = vset.pattern.permute.xlu1 %v456_v0  ;;  %452 = vset.pattern.permute.xlu0 %v456_v0  ;;  %v27_v1 = vld [vmem:[%s618_s0 + $0x8] sm:$0xff]  ;;  %v26_v2 = vld [vmem:[%s618_s0] sm:$0xff]  ;;  %v74_v5 = vld [vmem:[%s619_s3 + $0x10] sm:$0xff] }
   0x2   :  { %v72_v3 = vld [vmem:[%s619_s3] sm:$0xff]  ;;  %36 = vperm.xlu1 %454, %v27_v1   ;;  %31 = vperm.xlu0 %452, %v26_v2   ;;  %v73_v4 = vld [vmem:[%s619_s3 + $0x8] sm:$0xff]  ;;  %v75_v6 = vld [vmem:[%s619_s3 + $0x18] sm:$0xff]  ;;  %v40_v50 = vshrl.u32 %v39_v49, 7 }
   0x3   :  { %v386_v7 = vpack.c.bf16 %v73_v4, %v72_v3  ;;  %v390_v8 = vpack.c.bf16 %v75_v6, %v74_v5  ;;  %v76_v10 = vld [vmem:[%s619_s3 + $0x20] sm:$0xff]  ;;  %v77_v11 = vld [vmem:[%s619_s3 + $0x28] sm:$0xff]  ;;  %v78_v13 = vld [vmem:[%s619_s3 + $0x30] sm:$0xff] }
   0x4   :  { %v394_v12 = vpack.c.bf16 %v77_v11, %v76_v10  ;;  %v79_v14 = vld [vmem:[%s619_s3 + $0x38] sm:$0xff]  ;;  %v80_v16 = vld [vmem:[%s619_s3 + $0x40] sm:$0xff]  ;;  %v81_v17 = vld [vmem:[%s619_s3 + $0x48] sm:$0xff]  ;;  %v41_v51 = vsub.s32 0, %v40_v50  ;;  %v55_v52 = vsub.s32 1, %v40_v50 }
   0x5   :  { %387 = vmatprep.subr.bf16.mxu0 %v386_v7  ;;  %v398_v15 = vpack.c.bf16 %v79_v14, %v78_v13  ;;  %v402_v18 = vpack.c.bf16 %v81_v17, %v80_v16  ;;  %v172_v19 = vld [vmem:[%s620_s5] sm:$0xff]  ;;  %v173_v20 = vld [vmem:[%s620_s5 + $0x8] sm:$0xff]  ;;  %v174_v21 = vld [vmem:[%s620_s5 + $0x10] sm:$0xff] }
   0x6   :  { %455 = vset.pattern.permute.xlu1 %v457_v9  ;;  %453 = vset.pattern.permute.xlu0 %v457_v9  ;;  %v82_v22 = vld [vmem:[%s619_s3 + $0x50] sm:$0xff]  ;;  %v83_v23 = vld [vmem:[%s619_s3 + $0x58] sm:$0xff]  ;;  %v418_v24 = vpack.c.bf16 %v173_v20, %v172_v19  ;;  %v176_v27 = vld [vmem:[%s620_s5 + $0x20] sm:$0xff] }
   0x7   :  { %50 = vperm.xlu1 %455, %v27_v1   ;;  %46 = vperm.xlu0 %453, %v26_v2   ;;  %v175_v25 = vld [vmem:[%s620_s5 + $0x18] sm:$0xff]  ;;  %v177_v28 = vld [vmem:[%s620_s5 + $0x28] sm:$0xff]  ;;  %v406_v29 = vpack.c.bf16 %v83_v23, %v82_v22  ;;  %v84_v30 = vld [vmem:[%s619_s3 + $0x60] sm:$0xff] }
   0x8   :  { %389 = vmatpush3.bf16.msra.mxu0 %v386_v7  ;;  %v422_v26 = vpack.c.bf16 %v175_v25, %v174_v21  ;;  %419 = vmatprep.subr.bf16.mxu1 %v418_v24  ;;  %v85_v31 = vld [vmem:[%s619_s3 + $0x68] sm:$0xff]  ;;  %v426_v32 = vpack.c.bf16 %v177_v28, %v176_v27  ;;  %v178_v33 = vld [vmem:[%s620_s5 + $0x30] sm:$0xff]  ;;  %v179_v34 = vld [vmem:[%s620_s5 + $0x38] sm:$0xff] }
   0x9   :  { %391 = vmatprep.subr.bf16.mxu0 %v390_v8  ;;  %421 = vmatpush3.bf16.msra.mxu1 %v418_v24  ;;  %v410_v35 = vpack.c.bf16 %v85_v31, %v84_v30  ;;  %v86_v36 = vld [vmem:[%s619_s3 + $0x70] sm:$0xff]  ;;  %v87_v37 = vld [vmem:[%s619_s3 + $0x78] sm:$0xff]  ;;  %v430_v38 = vpack.c.bf16 %v179_v34, %v178_v33  ;;  %v180_v39 = vld [vmem:[%s620_s5 + $0x40] sm:$0xff] }
   0xa   :  { %423 = vmatprep.subr.bf16.mxu1 %v422_v26  ;;  %v181_v40 = vld [vmem:[%s620_s5 + $0x48] sm:$0xff]  ;;  %v414_v41 = vpack.c.bf16 %v87_v37, %v86_v36  ;;  %v182_v43 = vld [vmem:[%s620_s5 + $0x50] sm:$0xff]  ;;  %v183_v44 = vld [vmem:[%s620_s5 + $0x58] sm:$0xff] }
   0xb   :  { %v434_v42 = vpack.c.bf16 %v181_v40, %v180_v39  ;;  %v438_v45 = vpack.c.bf16 %v183_v44, %v182_v43  ;;  %v184_v46 = vld [vmem:[%s620_s5 + $0x60] sm:$0xff]  ;;  %v185_v47 = vld [vmem:[%s620_s5 + $0x68] sm:$0xff]  ;;  %v186_v7 = vld [vmem:[%s620_s5 + $0x70] sm:$0xff] }
   0xc   :  { %393 = vmatpush3.bf16.msra.mxu0 %v390_v8  ;;  %v442_v48 = vpack.c.bf16 %v185_v47, %v184_v46  ;;  %v28_v53 = vld [vmem:[%s621_s1] sm:$0x3]  ;;  %v187_v8 = vld [vmem:[%s620_s5 + $0x78] sm:$0xff] }
   0xd   :  { %395 = vmatprep.subr.bf16.mxu0 %v394_v12  ;;  %425 = vmatpush3.bf16.msra.mxu1 %v422_v26  ;;  %v42_v56 = vrot.slane %v28_v53, %v41_v51  ;;  %v56_v57 = vrot.slane %v28_v53, %v55_v52  ;;  %v277_v0 = vld [vmem:[%s622_s2] ss:$0 sm:$0xff]  ;;  %v446_v9 = vpack.c.bf16 %v187_v8, %v186_v7 }
   0xe   :  { %427 = vmatprep.subr.bf16.mxu1 %v426_v32  ;;  %v278_v10 = vld [vmem:[%s623_s4] ss:$0 sm:$0xff] }
   0xf   :  { %v279_v17 = vld [vmem:[%s624_s6] ss:$0 sm:$0xff] }
  0x10   :  { %397 = vmatpush3.bf16.msra.mxu0 %v394_v12 }
  0x11   :  { %399 = vmatprep.subr.bf16.mxu0 %v398_v15  ;;  %429 = vmatpush3.bf16.msra.mxu1 %v426_v32 }
  0x12   :  { %431 = vmatprep.subr.bf16.mxu1 %v430_v38 }
  0x14   :  { %401 = vmatpush3.bf16.msra.mxu0 %v398_v15 }
  0x15   :  { %403 = vmatprep.subr.bf16.mxu0 %v402_v18  ;;  %433 = vmatpush3.bf16.msra.mxu1 %v430_v38 }
  0x16   :  { %435 = vmatprep.subr.bf16.mxu1 %v434_v42 }
  0x18   :  { %405 = vmatpush3.bf16.msra.mxu0 %v402_v18 }
  0x19   :  { %407 = vmatprep.subr.bf16.mxu0 %v406_v29  ;;  %437 = vmatpush3.bf16.msra.mxu1 %v434_v42 }
  0x1a   :  { %439 = vmatprep.subr.bf16.mxu1 %v438_v45 }
  0x1c   :  { %409 = vmatpush3.bf16.msra.mxu0 %v406_v29 }
  0x1d   :  { %411 = vmatprep.subr.bf16.mxu0 %v410_v35  ;;  %441 = vmatpush3.bf16.msra.mxu1 %v438_v45 }
  0x1e   :  { %443 = vmatprep.subr.bf16.mxu1 %v442_v48 }
  0x20   :  { %413 = vmatpush3.bf16.msra.mxu0 %v410_v35 }
  0x21   :  { %415 = vmatprep.subr.bf16.mxu0 %v414_v41  ;;  %445 = vmatpush3.bf16.msra.mxu1 %v442_v48 }
  0x22   :  { %447 = vmatprep.subr.bf16.mxu1 %v446_v9 }
  0x24   :  { %417 = vmatpush3.bf16.msra.mxu0 %v414_v41 }
  0x25   :  { %449 = vmatpush3.bf16.msra.mxu1 %v446_v9 }
  0x81   :  { %v32_v54 = vpop.permute.xlu0 %31  ;;  %v37_v55 = vpop.permute.xlu1 %36 }
  0x82   :  { %v43_v60 = vmul.f32 %v42_v56, %v32_v54  ;;  %v44_v61 = vmul.f32 %v42_v56, %v37_v55 }
  0x86   :  { %v51_v58 = vpop.permute.xlu1 %50  ;;  %v47_v59 = vpop.permute.xlu0 %46 }
  0x87   :  { %v58_v62 = vmul.f32 %v56_v57, %v51_v58  ;;  %v57_v63 = vmul.f32 %v56_v57, %v47_v59 }
  0x89   :  { %v60_v1 = vadd.f32 %v58_v62, %v44_v61  ;;  %v59_v2 = vadd.f32 %v57_v63, %v43_v60 }
  0x8b   :  { %v68_v3 = vadd.f32 %v277_v0, %v59_v2  ;;  %v69_v4 = vadd.f32 %v277_v0, %v60_v1 }
  0x8d   :  { %v70_v5 = vmax.f32 %v68_v3, 0.0  ;;  %v71_v6 = vmax.f32 %v69_v4, 0.0 }
  0x8f   :  { %348 = vmatprep.mubr.f32.mxu0 %v70_v5 }
  0x90   :  { %349 = vmatmul.mubr.f32.vlgmr.msra.gmra.mrb[0].mxu0 %v71_v6 }
 0x163   :  { %v350_v11 = vpop.f32.mrb[0].mxu0 }
 0x164   :  { %v167_v12 = vadd.f32 %v350_v11, %v278_v10  ;;  %v161_v13 = vpop.f32.mrb[1].mxu0 }
 0x165   :  { %v162_v14 = vadd.f32 %v278_v10, %v161_v13 }
 0x166   :  { %v171_v16 = vmax.f32 %v167_v12, 0.0 }
 0x167   :  { %v170_v15 = vmax.f32 %v162_v14, 0.0 }
 0x169   :  { %383 = vmatprep.mubr.f32.mxu1 %v170_v15 }
 0x16a   :  { %384 = vmatmul.mubr.f32.vlgmr.msra.gmra.mrb[0].mxu1 %v171_v16 }
 0x23d   :  { %v385_v18 = vpop.f32.mrb[0].mxu1 }
 0x23e   :  { %v267_v19 = vadd.f32 %v385_v18, %v279_v17  ;;  %v261_v20 = vpop.f32.mrb[1].mxu1 }
 0x23f   :  { %v262_v21 = vadd.f32 %v279_v17, %v261_v20 }
 0x240   :  { %272 = vst.msk [vmem:[%s625_s7 + $0x8] sm:$0xff] %vm270_vm0, %v267_v19 }
 0x241   :  { %271 = vst.msk [vmem:[%s625_s7] sm:$0xff] %vm270_vm0, %v262_v21 }

</bundles_post_ra>
